<compile_context>
chip_gen: v7x
topology: tpu7x:2x2x1
jax: 0.10.0
libtpu: 0.0.40
codegen_flags: <defaults>
</compile_context>

<pallas_src>
import math
import jax
import jax.numpy as jnp
from jax.experimental import pallas as pl
from jax.experimental.pallas import tpu as pltpu

# ---------------- branch-conv hyper-params (assumed, see TODO above) -------------
KS = (3, 5, 7, 9)
PS = (1, 2, 3, 4)
KMAX = max(KS)
PMAX = (KMAX - 1) // 2


# =============================== fused Pallas kernel ==============================
def _make_block_kernel(n_blk, L2, project_sc):
    """Fused per-grid-step kernel. Static config: batch-fold, output length, shortcut."""
    K, P = KMAX, PMAX
    T = n_blk * L2
    f32, bf16 = jnp.float32, jnp.bfloat16

    def kernel(xc_ref, sc_ref, pmat_ref, w1_ref, b1_ref, w2_ref, b2_ref,
               sew1_ref, sew2_ref, wsc_ref, bsc_ref, o_ref):
        C_out = o_ref.shape[0]

        # ---- BranchConv1 (+BN1 folded) + ReLU: ONE deep matmul, depth K*C_in --------
        y1 = jnp.dot(w1_ref[...], xc_ref[...], preferred_element_type=f32)
        y1 = jnp.maximum(y1 + b1_ref[...], 0.0)          # Dropout = identity (eval)

        # ---- BranchConv2 (+BN2 folded): tap-stacked slab in registers, ONE matmul ---
        # lanes are (batch, length) flattened; pos = length index within each segment.
        pos = jax.lax.broadcasted_iota(jnp.int32, (C_out, T), 1) % L2
        pieces = []
        for t in range(K):
            s = P - t                                     # lane shift for tap t
            if s == 0:
                sh = y1
            elif s > 0:
                sh = jnp.concatenate(
                    [jnp.zeros((C_out, s), f32), y1[:, :T - s]], axis=1)
            else:
                sh = jnp.concatenate(
                    [y1[:, -s:], jnp.zeros((C_out, -s), f32)], axis=1)
            # valid iff the source position (pos + t - P) lies inside this batch segment
            valid = jnp.logical_and(pos >= P - t, pos < L2 + P - t)
            pieces.append(jnp.where(valid, sh, 0.0).astype(bf16))
        slab = jnp.concatenate(pieces, axis=0)            # (K*C_out, T) bf16
        y2 = jnp.dot(w2_ref[...], slab, preferred_element_type=f32) + b2_ref[...]

        # ---- SELayer1D: segment avg-pool via constant block matrix, 2 linears -------
        pooled = jnp.dot(y2, pmat_ref[...], preferred_element_type=f32)   # (C_out, T)
        h = jnp.maximum(jnp.dot(sew1_ref[...], pooled,
                                preferred_element_type=f32), 0.0)          # (hid, T)
        alpha = jax.nn.sigmoid(jnp.dot(sew2_ref[...], h,
                                       preferred_element_type=f32))        # (C_out, T)

        # ---- shortcut (maxpool done on raw input in wrapper; 1x1 conv + BN folded) --
        if project_sc:
            sc = jnp.dot(wsc_ref[...], sc_ref[...],
                         preferred_element_type=f32) + bsc_ref[...]
        else:
            sc = sc_ref[...]

        # ---- out = relu(op * alpha + shortcut) ---------------------------------------
        o_ref[...] = jnp.maximum(y2 * alpha + sc, 0.0).astype(o_ref.dtype)

    return kernel


# ================================ JAX wrapper =====================================
def maxpool1d_ceil(x, k):
    """MaxPool1d(kernel=k, stride=k, ceil_mode=True) on layout NCL (raw input only)."""
    N, C, L = x.shape
    L_out = -(-L // k)
    pad = L_out * k - L
    xp = jnp.pad(x, ((0, 0), (0, 0), (0, pad)), constant_values=-jnp.inf)
    return xp.reshape(N, C, L_out, k).max(axis=-1)


def _pick_n_blk(N, L2):
    """Batch elements folded per grid step: target >=128 lanes, but keep >=2 grid steps
    (v7x: 2 TensorCores need >=2 'parallel' steps), and divide N evenly."""
    n_blk = max(1, min(N, 128 // max(L2, 1)))
    if N >= 2:
        n_blk = max(1, min(n_blk, N // 2))
    while N % n_blk:
        n_blk -= 1
    return n_blk


def basic_block_forward(x, params, stride):
    N, C_in, L = x.shape
    C_out = params["b1"].shape[0]
    hid = params["se_w1"].shape[0]
    K, P = KMAX, PMAX
    L1 = (L + 2 * P - K) // stride + 1
    L2 = L1                                              # conv2 is stride-1 "same"
    n_blk = _pick_n_blk(N, L2)
    n_grid = N // n_blk
    T = n_blk * L2

    # ---- conv1 im2col (layout plumbing, wrapper side), batch folded into lanes -------
    x_pad = jnp.pad(x, ((0, 0), (0, 0), (P, P)))
    gidx = (jnp.arange(L1) * stride)[None, :] + jnp.arange(K)[:, None]     # (K, L1)
    x_cols = x_pad[:, :, gidx]                                             # (N, C_in, K, L1)
    x_cols = x_cols.transpose(0, 2, 1, 3).reshape(N, K * C_in, L1)
    x_cols = (x_cols.reshape(n_grid, n_blk, K * C_in, L1)
                    .transpose(0, 2, 1, 3)
                    .reshape(n_grid, K * C_in, T)
                    .astype(jnp.bfloat16))

    # ---- shortcut input (maxpool on raw x; projection conv runs in-kernel) ----------
    sc_in = x if stride == 1 else maxpool1d_ceil(x, stride)                # (N, C_sc, L2)
    assert sc_in.shape[-1] == L2, (sc_in.shape, L2)
    project_sc = (C_in != C_out)
    sc_dt = jnp.bfloat16 if project_sc else jnp.float32
    C_sc = sc_in.shape[1]
    sc_g = (sc_in.reshape(n_grid, n_blk, C_sc, L2)
                 .transpose(0, 2, 1, 3)
                 .reshape(n_grid, C_sc, T)
                 .astype(sc_dt))

    # block-diagonal averaging matrix: pools per batch segment AND broadcasts back.
    pmat = jnp.kron(jnp.eye(n_blk, dtype=jnp.float32),
                    jnp.ones((L2, L2), jnp.float32)) / L2                  # (T, T)

    kernel = _make_block_kernel(n_blk, L2, project_sc)

    const = lambda i: (0, 0)
    in_specs = [
        pl.BlockSpec((None, K * C_in, T), lambda i: (i, 0, 0)),   # conv1 im2col slab
        pl.BlockSpec((None, C_sc, T), lambda i: (i, 0, 0)),       # shortcut input
        pl.BlockSpec((T, T), const),                              # segment pool matrix
        pl.BlockSpec((C_out, K * C_in), const),                   # w1 (tap-stacked)
        pl.BlockSpec((C_out, 1), const),                          # b1 (BN1 shift)
        pl.BlockSpec((C_out, K * C_out), const),                  # w2 (tap-stacked)
        pl.BlockSpec((C_out, 1), const),                          # b2 (BN2 shift)
        pl.BlockSpec((hid, C_out), const),                        # se_w1
        pl.BlockSpec((C_out, hid), const),                        # se_w2
        pl.BlockSpec((C_out, C_in), const),                       # w_sc
        pl.BlockSpec((C_out, 1), const),                          # b_sc
    ]
    out_specs = pl.BlockSpec((None, C_out, T), lambda i: (i, 0, 0))

    out_g = pl.pallas_call(
        kernel,
        out_shape=jax.ShapeDtypeStruct((n_grid, C_out, T), jnp.float32),
        grid_spec=pltpu.PrefetchScalarGridSpec(
            num_scalar_prefetch=0,
            grid=(n_grid,),
            in_specs=in_specs,
            out_specs=out_specs,
        ),
        compiler_params=pltpu.CompilerParams(dimension_semantics=("parallel",)),
    )(x_cols, sc_g, pmat,
      params["w1p"], params["b1"], params["w2p"], params["b2"],
      params["se_w1"], params["se_w2"], params["w_sc"], params["b_sc"])

    # unfold the batch-in-lanes packing back to (N, C_out, L2)
    return (out_g.reshape(n_grid, C_out, n_blk, L2)
                 .transpose(0, 2, 1, 3)
                 .reshape(N, C_out, L2))


# --------------------------- deterministic parameter init ------------------------
def init_conv_weight(key, c_out, c_in, k):
    bound = 1.0 / math.sqrt(c_in * k)
    return jax.random.uniform(key, (c_out, c_in, k), jnp.float32, -bound, bound)


def init_linear_weight(key, c_out, c_in):
    bound = 1.0 / math.sqrt(c_in)
    return jax.random.uniform(key, (c_out, c_in), jnp.float32, -bound, bound)


def branch_weight(key, c_in, c_out):
    """BranchConv1D: 4 convs of kernel sizes KS, concatenated on out-channels; every
    branch is embedded (zero-padded over taps) into one (c_out, c_in, KMAX) weight."""
    C = c_out // 4
    keys = jax.random.split(key, 4)
    w_full = jnp.zeros((c_out, c_in, KMAX), jnp.float32)
    for i, (k, p) in enumerate(zip(KS, PS)):
        w = init_conv_weight(keys[i], C, c_in, k)
        off = PMAX - p
        w_full = w_full.at[i * C:(i + 1) * C, :, off:off + k].set(w)
    return w_full


def init_bn(key, c):
    k1, k2, k3, k4 = jax.random.split(key, 4)
    gamma = 1.0 + 0.1 * jax.random.normal(k1, (c,), jnp.float32)
    beta = 0.1 * jax.random.normal(k2, (c,), jnp.float32)
    mean = 0.1 * jax.random.normal(k3, (c,), jnp.float32)
    var = 1.0 + 0.1 * jnp.abs(jax.random.normal(k4, (c,), jnp.float32))
    return gamma, beta, mean, var


def bn_scale_shift(bn, eps=1e-5):
    gamma, beta, mean, var = bn
    scale = gamma / jnp.sqrt(var + eps)
    shift = beta - mean * scale
    return scale, shift


# ==================================== main ========================================
if __name__ == "__main__":
    N, C_in, C_out, L, stride = 2, 4, 32, 16, 2
    reduction = 16
    hid = C_out // reduction

    key = jax.random.PRNGKey(0)
    keys = jax.random.split(key, 10)
    x = jax.random.normal(keys[0], (N, C_in, L), jnp.float32)

    # stage 1: BranchConv1 (bias=False) + BN1, folded -> (C_out, K*C_in) bf16 (taps
    # stacked in the contraction dim; column order = t*C_in + c to match the im2col)
    w1_raw = branch_weight(keys[1], C_in, C_out)                   # (C_out, C_in, K)
    s1, sh1 = bn_scale_shift(init_bn(keys[2], C_out))
    w1p = ((w1_raw * s1[:, None, None]).transpose(0, 2, 1)
           .reshape(C_out, KMAX * C_in).astype(jnp.bfloat16))
    b1 = sh1[:, None]

    # stage 2: BranchConv2 (bias=False) + BN2, folded -> (C_out, K*C_out) bf16
    w2_raw = branch_weight(keys[3], C_out, C_out)
    s2, sh2 = bn_scale_shift(init_bn(keys[4], C_out))
    w2p = ((w2_raw * s2[:, None, None]).transpose(0, 2, 1)
           .reshape(C_out, KMAX * C_out).astype(jnp.bfloat16))
    b2 = sh2[:, None]

    # SE block linears (bias=False), kept f32
    se_w1 = init_linear_weight(keys[5], hid, C_out)                # (C//r, C)
    se_w2 = init_linear_weight(keys[6], C_out, hid)                # (C, C//r)

    # shortcut: 1x1 conv (bias=True, PyTorch default) + BN, folded
    w_sc_raw = init_conv_weight(keys[7], C_out, C_in, 1)[:, :, 0]  # (C_out, C_in)
    b_bound = 1.0 / math.sqrt(C_in)
    b_sc_raw = jax.random.uniform(keys[8], (C_out,), jnp.float32, -b_bound, b_bound)
    ssc, shsc = bn_scale_shift(init_bn(keys[9], C_out))
    w_sc = (w_sc_raw * ssc[:, None]).astype(jnp.bfloat16)
    b_sc = (ssc * b_sc_raw + shsc)[:, None]

    params = dict(w1p=w1p, b1=b1, w2p=w2p, b2=b2,
                  se_w1=se_w1, se_w2=se_w2, w_sc=w_sc, b_sc=b_sc)

    out = basic_block_forward(x, params, stride)
    out = jax.block_until_ready(out)
    assert out.shape == (N, C_out, 8), out.shape
    assert bool(jnp.all(jnp.isfinite(out)))
    print("KERNEL_OK")
</pallas_src>

<mosaic_0001>
module attributes {stable_mosaic.version = 11 : i64} {
  func.func @kernel(%arg0: i32, %arg1: memref<1x36x8xbf16, #tpu.memory_space<vmem>>, %arg2: memref<1x4x8xbf16, #tpu.memory_space<vmem>>, %arg3: memref<8x8xf32, #tpu.memory_space<vmem>>, %arg4: memref<32x36xbf16, #tpu.memory_space<vmem>>, %arg5: memref<32x1xf32, #tpu.memory_space<vmem>>, %arg6: memref<32x288xbf16, #tpu.memory_space<vmem>>, %arg7: memref<32x1xf32, #tpu.memory_space<vmem>>, %arg8: memref<2x32xf32, #tpu.memory_space<vmem>>, %arg9: memref<32x2xf32, #tpu.memory_space<vmem>>, %arg10: memref<32x4xbf16, #tpu.memory_space<vmem>>, %arg11: memref<32x1xf32, #tpu.memory_space<vmem>>, %arg12: memref<1x32x8xf32, #tpu.memory_space<vmem>>) attributes {dimension_semantics = [#tpu.dimension_semantics<parallel>], iteration_bounds = array<i64: 2>, scalar_prefetch = 0 : i64, scratch_operands = 0 : i64, tpu.core_type = #tpu.core_type<tc>, window_params = [{transform_indices = @transform_0, window_bounds = array<i64: 1, 36, 8>}, {transform_indices = @transform_1, window_bounds = array<i64: 1, 4, 8>}, {pipeline_mode = #tpu.pipeline_mode<synchronous>, transform_indices = @transform_2, window_bounds = array<i64: 8, 8>}, {pipeline_mode = #tpu.pipeline_mode<synchronous>, transform_indices = @transform_3, window_bounds = array<i64: 32, 36>}, {pipeline_mode = #tpu.pipeline_mode<synchronous>, transform_indices = @transform_4, window_bounds = array<i64: 32, 1>}, {pipeline_mode = #tpu.pipeline_mode<synchronous>, transform_indices = @transform_5, window_bounds = array<i64: 32, 288>}, {pipeline_mode = #tpu.pipeline_mode<synchronous>, transform_indices = @transform_6, window_bounds = array<i64: 32, 1>}, {pipeline_mode = #tpu.pipeline_mode<synchronous>, transform_indices = @transform_7, window_bounds = array<i64: 2, 32>}, {pipeline_mode = #tpu.pipeline_mode<synchronous>, transform_indices = @transform_8, window_bounds = array<i64: 32, 2>}, {pipeline_mode = #tpu.pipeline_mode<synchronous>, transform_indices = @transform_9, window_bounds = array<i64: 32, 4>}, {pipeline_mode = #tpu.pipeline_mode<synchronous>, transform_indices = @transform_10, window_bounds = array<i64: 32, 1>}, {transform_indices = @transform_11, window_bounds = array<i64: 1, 32, 8>}]} {
    %c0 = arith.constant 0 : index
    %c0_0 = arith.constant 0 : index
    %0 = vector.load %arg4[%c0, %c0_0] : memref<32x36xbf16, #tpu.memory_space<vmem>>, vector<32x36xbf16>
    %c0_1 = arith.constant 0 : index
    %c0_2 = arith.constant 0 : index
    %c0_3 = arith.constant 0 : index
    %1 = vector.load %arg1[%c0_1, %c0_2, %c0_3] : memref<1x36x8xbf16, #tpu.memory_space<vmem>>, vector<1x36x8xbf16>
    %2 = vector.shape_cast %1 : vector<1x36x8xbf16> to vector<36x8xbf16>
    %cst = arith.constant dense<0.000000e+00> : vector<32x8xf32>
    %3 = tpu.matmul %0, %2, %cst {dimension_numbers = #tpu.dot_dimension_numbers<[1], [0], [0], [1], [0, 0, 1, 1], [], []>} : vector<32x36xbf16>, vector<36x8xbf16>, vector<32x8xf32> -> vector<32x8xf32>
    %c0_4 = arith.constant 0 : index
    %c0_5 = arith.constant 0 : index
    %4 = vector.load %arg5[%c0_4, %c0_5] : memref<32x1xf32, #tpu.memory_space<vmem>>, vector<32x1xf32>
    %5 = vector.broadcast %4 : vector<32x1xf32> to vector<32x8xf32>
    %6 = arith.addf %3, %5 : vector<32x8xf32>
    %cst_6 = arith.constant 0.000000e+00 : f32
    %7 = vector.broadcast %cst_6 : f32 to vector<32x8xf32>
    %8 = arith.maximumf %6, %7 : vector<32x8xf32>
    %9 = tpu.iota {dimensions = array<i32: 1>} : vector<32x8xi32>
    %c8_i32 = arith.constant 8 : i32
    %c0_i32 = arith.constant 0 : i32
    %10 = arith.cmpi eq, %c8_i32, %c0_i32 : i32
    %c1_i32 = arith.constant 1 : i32
    %11 = arith.select %10, %c1_i32, %c8_i32 : i32
    %12 = vector.broadcast %11 : i32 to vector<32x8xi32>
    %13 = arith.remsi %9, %12 : vector<32x8xi32>
    %c0_i32_7 = arith.constant 0 : i32
    %14 = vector.broadcast %c0_i32_7 : i32 to vector<32x8xi32>
    %15 = arith.cmpi ne, %13, %14 : vector<32x8xi32>
    %c0_i32_8 = arith.constant 0 : i32
    %16 = vector.broadcast %c0_i32_8 : i32 to vector<32x8xi32>
    %17 = arith.cmpi slt, %13, %16 : vector<32x8xi32>
    %c0_i32_9 = arith.constant 0 : i32
    %18 = arith.cmpi slt, %11, %c0_i32_9 : i32
    %19 = vector.broadcast %18 : i1 to vector<32x8xi1>
    %20 = vector.broadcast %19 : vector<32x8xi1> to vector<32x8xi1>
    %21 = arith.xori %17, %20 : vector<32x8xi1>
    %22 = arith.andi %21, %15 : vector<32x8xi1>
    %23 = vector.broadcast %11 : i32 to vector<32x8xi32>
    %24 = arith.addi %13, %23 : vector<32x8xi32>
    %25 = arith.select %22, %24, %13 : vector<32x8xi1>, vector<32x8xi32>
    %cst_10 = arith.constant 0.000000e+00 : f32
    %26 = vector.broadcast %cst_10 : f32 to vector<32x4xf32>
    %27 = vector.extract_strided_slice %8 {offsets = [0, 0], sizes = [32, 4], strides = [1, 1]} : vector<32x8xf32> to vector<32x4xf32>
    %28 = tpu.concatenate %26, %27 in 1 : vector<32x4xf32>, vector<32x4xf32> -> vector<32x8xf32>
    %c4_i32 = arith.constant 4 : i32
    %29 = vector.broadcast %c4_i32 : i32 to vector<32x8xi32>
    %30 = arith.cmpi sge, %25, %29 : vector<32x8xi32>
    %c12_i32 = arith.constant 12 : i32
    %31 = vector.broadcast %c12_i32 : i32 to vector<32x8xi32>
    %32 = arith.cmpi slt, %25, %31 : vector<32x8xi32>
    %33 = arith.andi %30, %32 : vector<32x8xi1>
    %cst_11 = arith.constant 0.000000e+00 : f32
    %34 = vector.broadcast %cst_11 : f32 to vector<32x8xf32>
    %35 = arith.select %33, %28, %34 : vector<32x8xi1>, vector<32x8xf32>
    %36 = arith.truncf %35 : vector<32x8xf32> to vector<32x8xbf16>
    %cst_12 = arith.constant 0.000000e+00 : f32
    %37 = vector.broadcast %cst_12 : f32 to vector<32x3xf32>
    %38 = vector.extract_strided_slice %8 {offsets = [0, 0], sizes = [32, 5], strides = [1, 1]} : vector<32x8xf32> to vector<32x5xf32>
    %39 = tpu.concatenate %37, %38 in 1 : vector<32x3xf32>, vector<32x5xf32> -> vector<32x8xf32>
    %c3_i32 = arith.constant 3 : i32
    %40 = vector.broadcast %c3_i32 : i32 to vector<32x8xi32>
    %41 = arith.cmpi sge, %25, %40 : vector<32x8xi32>
    %c11_i32 = arith.constant 11 : i32
    %42 = vector.broadcast %c11_i32 : i32 to vector<32x8xi32>
    %43 = arith.cmpi slt, %25, %42 : vector<32x8xi32>
    %44 = arith.andi %41, %43 : vector<32x8xi1>
    %cst_13 = arith.constant 0.000000e+00 : f32
    %45 = vector.broadcast %cst_13 : f32 to vector<32x8xf32>
    %46 = arith.select %44, %39, %45 : vector<32x8xi1>, vector<32x8xf32>
    %47 = arith.truncf %46 : vector<32x8xf32> to vector<32x8xbf16>
    %cst_14 = arith.constant 0.000000e+00 : f32
    %48 = vector.broadcast %cst_14 : f32 to vector<32x2xf32>
    %49 = vector.extract_strided_slice %8 {offsets = [0, 0], sizes = [32, 6], strides = [1, 1]} : vector<32x8xf32> to vector<32x6xf32>
    %50 = tpu.concatenate %48, %49 in 1 : vector<32x2xf32>, vector<32x6xf32> -> vector<32x8xf32>
    %c2_i32 = arith.constant 2 : i32
    %51 = vector.broadcast %c2_i32 : i32 to vector<32x8xi32>
    %52 = arith.cmpi sge, %25, %51 : vector<32x8xi32>
    %c10_i32 = arith.constant 10 : i32
    %53 = vector.broadcast %c10_i32 : i32 to vector<32x8xi32>
    %54 = arith.cmpi slt, %25, %53 : vector<32x8xi32>
    %55 = arith.andi %52, %54 : vector<32x8xi1>
    %cst_15 = arith.constant 0.000000e+00 : f32
    %56 = vector.broadcast %cst_15 : f32 to vector<32x8xf32>
    %57 = arith.select %55, %50, %56 : vector<32x8xi1>, vector<32x8xf32>
    %58 = arith.truncf %57 : vector<32x8xf32> to vector<32x8xbf16>
    %cst_16 = arith.constant 0.000000e+00 : f32
    %59 = vector.broadcast %cst_16 : f32 to vector<32x1xf32>
    %60 = vector.extract_strided_slice %8 {offsets = [0, 0], sizes = [32, 7], strides = [1, 1]} : vector<32x8xf32> to vector<32x7xf32>
    %61 = tpu.concatenate %59, %60 in 1 : vector<32x1xf32>, vector<32x7xf32> -> vector<32x8xf32>
    %c1_i32_17 = arith.constant 1 : i32
    %62 = vector.broadcast %c1_i32_17 : i32 to vector<32x8xi32>
    %63 = arith.cmpi sge, %25, %62 : vector<32x8xi32>
    %c9_i32 = arith.constant 9 : i32
    %64 = vector.broadcast %c9_i32 : i32 to vector<32x8xi32>
    %65 = arith.cmpi slt, %25, %64 : vector<32x8xi32>
    %66 = arith.andi %63, %65 : vector<32x8xi1>
    %cst_18 = arith.constant 0.000000e+00 : f32
    %67 = vector.broadcast %cst_18 : f32 to vector<32x8xf32>
    %68 = arith.select %66, %61, %67 : vector<32x8xi1>, vector<32x8xf32>
    %69 = arith.truncf %68 : vector<32x8xf32> to vector<32x8xbf16>
    %c0_i32_19 = arith.constant 0 : i32
    %70 = vector.broadcast %c0_i32_19 : i32 to vector<32x8xi32>
    %71 = arith.cmpi sge, %25, %70 : vector<32x8xi32>
    %c8_i32_20 = arith.constant 8 : i32
    %72 = vector.broadcast %c8_i32_20 : i32 to vector<32x8xi32>
    %73 = arith.cmpi slt, %25, %72 : vector<32x8xi32>
    %74 = arith.andi %71, %73 : vector<32x8xi1>
    %cst_21 = arith.constant 0.000000e+00 : f32
    %75 = vector.broadcast %cst_21 : f32 to vector<32x8xf32>
    %76 = arith.select %74, %8, %75 : vector<32x8xi1>, vector<32x8xf32>
    %77 = arith.truncf %76 : vector<32x8xf32> to vector<32x8xbf16>
    %78 = vector.extract_strided_slice %8 {offsets = [0, 1], sizes = [32, 7], strides = [1, 1]} : vector<32x8xf32> to vector<32x7xf32>
    %cst_22 = arith.constant 0.000000e+00 : f32
    %79 = vector.broadcast %cst_22 : f32 to vector<32x1xf32>
    %80 = tpu.concatenate %78, %79 in 1 : vector<32x7xf32>, vector<32x1xf32> -> vector<32x8xf32>
    %c-1_i32 = arith.constant -1 : i32
    %81 = vector.broadcast %c-1_i32 : i32 to vector<32x8xi32>
    %82 = arith.cmpi sge, %25, %81 : vector<32x8xi32>
    %c7_i32 = arith.constant 7 : i32
    %83 = vector.broadcast %c7_i32 : i32 to vector<32x8xi32>
    %84 = arith.cmpi slt, %25, %83 : vector<32x8xi32>
    %85 = arith.andi %82, %84 : vector<32x8xi1>
    %cst_23 = arith.constant 0.000000e+00 : f32
    %86 = vector.broadcast %cst_23 : f32 to vector<32x8xf32>
    %87 = arith.select %85, %80, %86 : vector<32x8xi1>, vector<32x8xf32>
    %88 = arith.truncf %87 : vector<32x8xf32> to vector<32x8xbf16>
    %89 = vector.extract_strided_slice %8 {offsets = [0, 2], sizes = [32, 6], strides = [1, 1]} : vector<32x8xf32> to vector<32x6xf32>
    %cst_24 = arith.constant 0.000000e+00 : f32
    %90 = vector.broadcast %cst_24 : f32 to vector<32x2xf32>
    %91 = tpu.concatenate %89, %90 in 1 : vector<32x6xf32>, vector<32x2xf32> -> vector<32x8xf32>
    %c-2_i32 = arith.constant -2 : i32
    %92 = vector.broadcast %c-2_i32 : i32 to vector<32x8xi32>
    %93 = arith.cmpi sge, %25, %92 : vector<32x8xi32>
    %c6_i32 = arith.constant 6 : i32
    %94 = vector.broadcast %c6_i32 : i32 to vector<32x8xi32>
    %95 = arith.cmpi slt, %25, %94 : vector<32x8xi32>
    %96 = arith.andi %93, %95 : vector<32x8xi1>
    %cst_25 = arith.constant 0.000000e+00 : f32
    %97 = vector.broadcast %cst_25 : f32 to vector<32x8xf32>
    %98 = arith.select %96, %91, %97 : vector<32x8xi1>, vector<32x8xf32>
    %99 = arith.truncf %98 : vector<32x8xf32> to vector<32x8xbf16>
    %100 = vector.extract_strided_slice %8 {offsets = [0, 3], sizes = [32, 5], strides = [1, 1]} : vector<32x8xf32> to vector<32x5xf32>
    %cst_26 = arith.constant 0.000000e+00 : f32
    %101 = vector.broadcast %cst_26 : f32 to vector<32x3xf32>
    %102 = tpu.concatenate %100, %101 in 1 : vector<32x5xf32>, vector<32x3xf32> -> vector<32x8xf32>
    %c-3_i32 = arith.constant -3 : i32
    %103 = vector.broadcast %c-3_i32 : i32 to vector<32x8xi32>
    %104 = arith.cmpi sge, %25, %103 : vector<32x8xi32>
    %c5_i32 = arith.constant 5 : i32
    %105 = vector.broadcast %c5_i32 : i32 to vector<32x8xi32>
    %106 = arith.cmpi slt, %25, %105 : vector<32x8xi32>
    %107 = arith.andi %104, %106 : vector<32x8xi1>
    %cst_27 = arith.constant 0.000000e+00 : f32
    %108 = vector.broadcast %cst_27 : f32 to vector<32x8xf32>
    %109 = arith.select %107, %102, %108 : vector<32x8xi1>, vector<32x8xf32>
    %110 = arith.truncf %109 : vector<32x8xf32> to vector<32x8xbf16>
    %111 = vector.extract_strided_slice %8 {offsets = [0, 4], sizes = [32, 4], strides = [1, 1]} : vector<32x8xf32> to vector<32x4xf32>
    %cst_28 = arith.constant 0.000000e+00 : f32
    %112 = vector.broadcast %cst_28 : f32 to vector<32x4xf32>
    %113 = tpu.concatenate %111, %112 in 1 : vector<32x4xf32>, vector<32x4xf32> -> vector<32x8xf32>
    %c-4_i32 = arith.constant -4 : i32
    %114 = vector.broadcast %c-4_i32 : i32 to vector<32x8xi32>
    %115 = arith.cmpi sge, %25, %114 : vector<32x8xi32>
    %c4_i32_29 = arith.constant 4 : i32
    %116 = vector.broadcast %c4_i32_29 : i32 to vector<32x8xi32>
    %117 = arith.cmpi slt, %25, %116 : vector<32x8xi32>
    %118 = arith.andi %115, %117 : vector<32x8xi1>
    %cst_30 = arith.constant 0.000000e+00 : f32
    %119 = vector.broadcast %cst_30 : f32 to vector<32x8xf32>
    %120 = arith.select %118, %113, %119 : vector<32x8xi1>, vector<32x8xf32>
    %121 = arith.truncf %120 : vector<32x8xf32> to vector<32x8xbf16>
    %122 = tpu.concatenate %36, %47, %58, %69, %77, %88, %99, %110, %121 in 0 : vector<32x8xbf16>, vector<32x8xbf16>, vector<32x8xbf16>, vector<32x8xbf16>, vector<32x8xbf16>, vector<32x8xbf16>, vector<32x8xbf16>, vector<32x8xbf16>, vector<32x8xbf16> -> vector<288x8xbf16>
    %c0_31 = arith.constant 0 : index
    %c0_32 = arith.constant 0 : index
    %123 = vector.load %arg6[%c0_31, %c0_32] : memref<32x288xbf16, #tpu.memory_space<vmem>>, vector<32x288xbf16>
    %cst_33 = arith.constant dense<0.000000e+00> : vector<32x8xf32>
    %124 = tpu.matmul %123, %122, %cst_33 {dimension_numbers = #tpu.dot_dimension_numbers<[1], [0], [0], [1], [0, 0, 1, 1], [], []>} : vector<32x288xbf16>, vector<288x8xbf16>, vector<32x8xf32> -> vector<32x8xf32>
    %c0_34 = arith.constant 0 : index
    %c0_35 = arith.constant 0 : index
    %125 = vector.load %arg7[%c0_34, %c0_35] : memref<32x1xf32, #tpu.memory_space<vmem>>, vector<32x1xf32>
    %126 = vector.broadcast %125 : vector<32x1xf32> to vector<32x8xf32>
    %127 = arith.addf %124, %126 : vector<32x8xf32>
    %c0_36 = arith.constant 0 : index
    %c0_37 = arith.constant 0 : index
    %128 = vector.load %arg3[%c0_36, %c0_37] : memref<8x8xf32, #tpu.memory_space<vmem>>, vector<8x8xf32>
    %cst_38 = arith.constant dense<0.000000e+00> : vector<32x8xf32>
    %129 = tpu.matmul %127, %128, %cst_38 {dimension_numbers = #tpu.dot_dimension_numbers<[1], [0], [0], [1], [0, 0, 1, 1], [], []>} : vector<32x8xf32>, vector<8x8xf32>, vector<32x8xf32> -> vector<32x8xf32>
    %c0_39 = arith.constant 0 : index
    %c0_40 = arith.constant 0 : index
    %130 = vector.load %arg8[%c0_39, %c0_40] : memref<2x32xf32, #tpu.memory_space<vmem>>, vector<2x32xf32>
    %cst_41 = arith.constant dense<0.000000e+00> : vector<2x8xf32>
    %131 = tpu.matmul %130, %129, %cst_41 {dimension_numbers = #tpu.dot_dimension_numbers<[1], [0], [0], [1], [0, 0, 1, 1], [], []>} : vector<2x32xf32>, vector<32x8xf32>, vector<2x8xf32> -> vector<2x8xf32>
    %cst_42 = arith.constant 0.000000e+00 : f32
    %132 = vector.broadcast %cst_42 : f32 to vector<2x8xf32>
    %133 = arith.maximumf %131, %132 : vector<2x8xf32>
    %c0_43 = arith.constant 0 : index
    %c0_44 = arith.constant 0 : index
    %134 = vector.load %arg9[%c0_43, %c0_44] : memref<32x2xf32, #tpu.memory_space<vmem>>, vector<32x2xf32>
    %cst_45 = arith.constant dense<0.000000e+00> : vector<32x8xf32>
    %135 = tpu.matmul %134, %133, %cst_45 {dimension_numbers = #tpu.dot_dimension_numbers<[1], [0], [0], [1], [0, 0, 1, 1], [], []>} : vector<32x2xf32>, vector<2x8xf32>, vector<32x8xf32> -> vector<32x8xf32>
    %136 = arith.negf %135 : vector<32x8xf32>
    %137 = math.exp %136 : vector<32x8xf32>
    %cst_46 = arith.constant 1.000000e+00 : f32
    %138 = vector.broadcast %cst_46 : f32 to vector<32x8xf32>
    %139 = arith.addf %138, %137 : vector<32x8xf32>
    %140 = arith.divf %138, %139 : vector<32x8xf32>
    %c0_47 = arith.constant 0 : index
    %c0_48 = arith.constant 0 : index
    %141 = vector.load %arg10[%c0_47, %c0_48] : memref<32x4xbf16, #tpu.memory_space<vmem>>, vector<32x4xbf16>
    %c0_49 = arith.constant 0 : index
    %c0_50 = arith.constant 0 : index
    %c0_51 = arith.constant 0 : index
    %142 = vector.load %arg2[%c0_49, %c0_50, %c0_51] : memref<1x4x8xbf16, #tpu.memory_space<vmem>>, vector<1x4x8xbf16>
    %143 = vector.shape_cast %142 : vector<1x4x8xbf16> to vector<4x8xbf16>
    %cst_52 = arith.constant dense<0.000000e+00> : vector<32x8xf32>
    %144 = tpu.matmul %141, %143, %cst_52 {dimension_numbers = #tpu.dot_dimension_numbers<[1], [0], [0], [1], [0, 0, 1, 1], [], []>} : vector<32x4xbf16>, vector<4x8xbf16>, vector<32x8xf32> -> vector<32x8xf32>
    %c0_53 = arith.constant 0 : index
    %c0_54 = arith.constant 0 : index
    %145 = vector.load %arg11[%c0_53, %c0_54] : memref<32x1xf32, #tpu.memory_space<vmem>>, vector<32x1xf32>
    %146 = vector.broadcast %145 : vector<32x1xf32> to vector<32x8xf32>
    %147 = arith.addf %144, %146 : vector<32x8xf32>
    %148 = arith.mulf %127, %140 : vector<32x8xf32>
    %149 = arith.addf %148, %147 : vector<32x8xf32>
    %cst_55 = arith.constant 0.000000e+00 : f32
    %150 = vector.broadcast %cst_55 : f32 to vector<32x8xf32>
    %151 = arith.maximumf %149, %150 : vector<32x8xf32>
    %c0_56 = arith.constant 0 : index
    %c0_57 = arith.constant 0 : index
    %c0_58 = arith.constant 0 : index
    %152 = vector.load %arg12[%c0_56, %c0_57, %c0_58] : memref<1x32x8xf32, #tpu.memory_space<vmem>>, vector<1x32x8xf32>
    %153 = vector.shape_cast %152 : vector<1x32x8xf32> to vector<32x8xf32>
    %154 = vector.shape_cast %151 : vector<32x8xf32> to vector<1x32x8xf32>
    tpu.vector_store %arg12[%c0_56, %c0_57, %c0_58], %154 {strides = array<i32>} : memref<1x32x8xf32, #tpu.memory_space<vmem>>, vector<1x32x8xf32>,
    return
  }
  func.func @transform_0(%arg0: i32) -> (i32, i32, i32) {
    %c0_i32 = arith.constant 0 : i32
    %c0_i32_0 = arith.constant 0 : i32
    %c0_i32_1 = arith.constant 0 : i32
    return %arg0, %c0_i32, %c0_i32_0 : i32, i32, i32
  }
  func.func @transform_1(%arg0: i32) -> (i32, i32, i32) {
    %c0_i32 = arith.constant 0 : i32
    %c0_i32_0 = arith.constant 0 : i32
    %c0_i32_1 = arith.constant 0 : i32
    return %arg0, %c0_i32, %c0_i32_0 : i32, i32, i32
  }
  func.func @transform_2(%arg0: i32) -> (i32, i32) {
    %c0_i32 = arith.constant 0 : i32
    %c0_i32_0 = arith.constant 0 : i32
    %c0_i32_1 = arith.constant 0 : i32
    return %c0_i32, %c0_i32_0 : i32, i32
  }
  func.func @transform_3(%arg0: i32) -> (i32, i32) {
    %c0_i32 = arith.constant 0 : i32
    %c0_i32_0 = arith.constant 0 : i32
    %c0_i32_1 = arith.constant 0 : i32
    return %c0_i32, %c0_i32_0 : i32, i32
  }
  func.func @transform_4(%arg0: i32) -> (i32, i32) {
    %c0_i32 = arith.constant 0 : i32
    %c0_i32_0 = arith.constant 0 : i32
    %c0_i32_1 = arith.constant 0 : i32
    return %c0_i32, %c0_i32_0 : i32, i32
  }
  func.func @transform_5(%arg0: i32) -> (i32, i32) {
    %c0_i32 = arith.constant 0 : i32
    %c0_i32_0 = arith.constant 0 : i32
    %c0_i32_1 = arith.constant 0 : i32
    return %c0_i32, %c0_i32_0 : i32, i32
  }
  func.func @transform_6(%arg0: i32) -> (i32, i32) {
    %c0_i32 = arith.constant 0 : i32
    %c0_i32_0 = arith.constant 0 : i32
    %c0_i32_1 = arith.constant 0 : i32
    return %c0_i32, %c0_i32_0 : i32, i32
  }
  func.func @transform_7(%arg0: i32) -> (i32, i32) {
    %c0_i32 = arith.constant 0 : i32
    %c0_i32_0 = arith.constant 0 : i32
    %c0_i32_1 = arith.constant 0 : i32
    return %c0_i32, %c0_i32_0 : i32, i32
  }
  func.func @transform_8(%arg0: i32) -> (i32, i32) {
    %c0_i32 = arith.constant 0 : i32
    %c0_i32_0 = arith.constant 0 : i32
    %c0_i32_1 = arith.constant 0 : i32
    return %c0_i32, %c0_i32_0 : i32, i32
  }
  func.func @transform_9(%arg0: i32) -> (i32, i32) {
    %c0_i32 = arith.constant 0 : i32
    %c0_i32_0 = arith.constant 0 : i32
    %c0_i32_1 = arith.constant 0 : i32
    return %c0_i32, %c0_i32_0 : i32, i32
  }
  func.func @transform_10(%arg0: i32) -> (i32, i32) {
    %c0_i32 = arith.constant 0 : i32
    %c0_i32_0 = arith.constant 0 : i32
    %c0_i32_1 = arith.constant 0 : i32
    return %c0_i32, %c0_i32_0 : i32, i32
  }
  func.func @transform_11(%arg0: i32) -> (i32, i32, i32) {
    %c0_i32 = arith.constant 0 : i32
    %c0_i32_0 = arith.constant 0 : i32
    %c0_i32_1 = arith.constant 0 : i32
    return %arg0, %c0_i32, %c0_i32_0 : i32, i32, i32
  }
}

</mosaic_0001>

<bundles_post_ra>
// kernel: tpu_custom_call.1
= control target key start
LH: loop header
LB: loop body
LE: loop exit
PB: predicated region body
PF: predicated region fallthrough
CT: control target
= control target key end

     0   :  { %s1831_s17 = smov 0   ;;  %s2103_s0 = inlined_call_operand.vmem [shape: bf16[2,36,8], index: 0, kind: input, shape index: {}]   ;;  %s2104_s1 = inlined_call_operand.vmem [shape: bf16[2,4,8], index: 1, kind: input, shape index: {}]   ;;  %s2105_s2 = inlined_call_operand.vmem [shape: f32[8,8], index: 2, kind: input, shape index: {}]   ;;  %s2106_s3 = inlined_call_operand.vmem [shape: bf16[32,36], index: 3, kind: input, shape index: {}]   ;;  %s2107_s4 = inlined_call_operand.vmem [shape: f32[32,1], index: 4, kind: input, shape index: {}]   ;;  %s2108_s5 = inlined_call_operand.vmem [shape: bf16[32,288], index: 5, kind: input, shape index: {}]   ;;  %s2109_s6 = inlined_call_operand.vmem [shape: f32[32,1], index: 6, kind: input, shape index: {}]   ;;  %s2110_s7 = inlined_call_operand.vmem [shape: f32[2,32], index: 7, kind: input, shape index: {}]   ;;  %s2111_s8 = inlined_call_operand.vmem [shape: f32[32,2], index: 8, kind: input, shape index: {}]   ;;  %s2112_s9 = inlined_call_operand.vmem [shape: bf16[32,4], index: 9, kind: input, shape index: {}]   ;;  %s2113_s10 = inlined_call_operand.vmem [shape: f32[32,1], index: 10, kind: input, shape index: {}]   ;;  %s2114_s11 = inlined_call_operand.vmem [shape: f32[2,32,8], index: 11, kind: output, shape index: {}]  }
   0x1 LB: > { %s1410_s18 = sadd.s32 4294967295, %s1757_s17   ;;  %p1414_p0 = scmp.ge.s32.totalorder %s1757_s17, 1  ;;  %s1757_s17 = sphi %s1831_s17, %s21_s17  }
   0x2   : > { %p346_p1 = scmp.lt.s32.totalorder %s1757_s17, 3 }
   0x4   : > { %p347_p2 = pnand %p1414_p0, %p346_p1 }
   0x5   : > { %p390_p3 = scmp.lt.s32.totalorder (!%p347_p2), %s1410_s18, 1  ;;  %v1723_v0 = vld [vmem:[%s2106_s3] sm:$0xff] (!%p347_p2)   ;;  %vm463_vm0 = vcmask (!%p347_p2), 293888   ;;  %v416_v2 = vld [vmem:[%s2107_s4 + $0x10] sm:$0xff] (!%p347_p2)  ;;  %v1759_v3 = vmov (!%p347_p2), 0   ;;  %v415_v4 = vld [vmem:[%s2107_s4 + $0x8] sm:$0xff] (!%p347_p2)  ;;  %v527_v41 = vlaneseq (!%p347_p2) }
   0x6   : > { %350 = sbr.rel (%p347_p2) target bundleno = 1315 (0x523), region = 64  ;;  %v414_v1 = vld [vmem:[%s2107_s4] sm:$0xff] (!%p347_p2)  ;;  %1564 = vmatprep.mubr.msk.bf16.mxu0 (!%p347_p2), %vm463_vm0, %v1723_v0  ;;  %1638 = vset.pattern.permute.xlu0 (!%p347_p2), %v1759_v3  ;;  %v417_v5 = vld [vmem:[%s2107_s4 + $0x18] sm:$0xff] (!%p347_p2)  ;;  %vm470_vm1 = vcmask (!%p347_p2), 1041408   ;;  %v1724_v10 = vld [vmem:[%s2106_s3 + $0x8] sm:$0xff] (!%p347_p2)   ;;  %s1760_s16 = smov (!%p347_p2), 4  }
   0x7   : > { %420 = vperm.xlu0 (!%p347_p2), %1638, %v414_v1   ;;  %1639 = vset.pattern.permute.xlu1 (!%p347_p2), %v1759_v3  ;;  %s1761_s19 = smov (!%p347_p2), 3   ;;  %s1762_s20 = smov (!%p347_p2), 127   ;;  %v1727_v31 = vld [vmem:[%s2108_s5 + $0x4] ss:$12 sps:$4 sm:$0xff] (!%p347_p2)   ;;  %v1728_v32 = vld [vmem:[%s2108_s5 + $0x8] ss:$12 sps:$4 sm:$0xff] (!%p347_p2)  }
   0x8   : > { %430 = vperm.xlu1 (!%p347_p2), %1639, %v416_v2   ;;  %s1763_s21 = smov (!%p347_p2), 2   ;;  %s1764_s22 = smov (!%p347_p2), 126   ;;  %862 = vmatprep.mubr.bf16.mxu1 (!%p347_p2), %v1727_v31  ;;  %vm823_vm2 = vcmask (!%p347_p2), 261120   ;;  %v770_v33 = vld [vmem:[%s2109_s6 + $0x8] sm:$0xff] (!%p347_p2)  ;;  %v769_v34 = vld [vmem:[%s2109_s6] sm:$0xff] (!%p347_p2)  ;;  %v772_v35 = vld [vmem:[%s2109_s6 + $0x18] sm:$0xff] (!%p347_p2) }
   0x9   : > { %s1765_s23 = smov (!%p347_p2), 1   ;;  %s1766_s24 = smov (!%p347_p2), 125   ;;  %v771_v36 = vld [vmem:[%s2109_s6 + $0x10] sm:$0xff] (!%p347_p2)  ;;  %v1236_v37 = vld [vmem:[%s2113_s10 + $0x8] sm:$0xff] (!%p347_p2)  ;;  %v1235_v38 = vld [vmem:[%s2113_s10] sm:$0xff] (!%p347_p2)  ;;  %v528_v42 = vand.u32 (!%p347_p2), 127, %v527_v41 }
   0xa   : > { %s1767_s29 = smov (!%p347_p2), 124   ;;  %v1238_v39 = vld [vmem:[%s2113_s10 + $0x18] sm:$0xff] (!%p347_p2)  ;;  %v1237_v40 = vld [vmem:[%s2113_s10 + $0x10] sm:$0xff] (!%p347_p2)  ;;  %vm557_vm3 = vcmask (!%p347_p2), 31744   ;;  %vm583_vm5 = vcmask (!%p347_p2), 23552   ;;  %vm670_vm6 = vcmask (!%p347_p2), 56320  }
   0xb   : > { %425 = vperm.xlu0 (!%p347_p2), %1638, %v415_v4   ;;  %v1900_v43 = vand.u32 (!%p347_p2), 7, %v528_v42  ;;  %vm609_vm11 = vcmask (!%p347_p2), 15360   ;;  %vm696_vm12 = vcmask (!%p347_p2), 48128  }
   0xc   : > { %435 = vperm.xlu1 (!%p347_p2), %1639, %v417_v5  }
   0xd   : > { %s2130_s18 = smov (!%p390_p3, %s1410_s18), 1  ;;  %vm562_vm4 = vcmp.ge.s32.totalorder %v1900_v43, 4  ;;  %vm676_vm8 = vcmp.lt.s32.totalorder %v1900_v43, 7  ;;  %vm588_vm9 = vcmp.ge.s32.totalorder %v1900_v43, 3  ;;  %vm702_vm14 = vcmp.lt.s32.totalorder %v1900_v43, 6 }
   0xe   : > { %s1617_s27 = smul.u32 20, %s2130_s18  ;;  %vm1905_vm7 = vmpackc.low %vm562_vm4, %vm562_vm4  ;;  %vm614_vm15 = vcmp.ge.s32.totalorder %v1900_v43, 2  ;;  %vm635_vm4 = vcmask 7168   ;;  %s1416_s26 = sshll.u32 %s2130_s18, 1 }
   0xf   : > { %vm1923_vm10 = vmpackc.low %vm676_vm8, %vm676_vm8  ;;  %vm640_vm8 = vcmp.ge.s32.totalorder %v1900_v43, 1 }
  0x10   : > { %s394_s13 = scalar_lea.vmem %s2103_s0, %s1617_s27  ;;  %vm1936_vm13 = vmpackc.low %vm588_vm9, %vm588_vm9 }
  0x11   : > { %v1720_v6 = vld [vmem:[%s394_s13] sm:$0xff]   ;;  %v1721_v7 = vld [vmem:[%s394_s13 + $0x8] sm:$0xff]   ;;  %v1722_v8 = vld [vmem:[%s394_s13 + $0x10] ss:$0 sps:$4 sm:$0x33]  }
  0x12   : > { %1558 = vmatprep.subr.bf16.mxu0 %v1720_v6  ;;  %v472_v9 = vsel %vm470_vm1, %v1722_v8, 0 }
  0x13   : > { %1559 = vmatpush3.bf16.msra.mxu0 %v1720_v6 }
  0x14   : > { %1560 = vmatprep.subr.bf16.mxu0 %v1721_v7 }
  0x17   : > { %1561 = vmatpush3.bf16.msra.mxu0 %v1721_v7 }
  0x18   : > { %1615 = vmatprep.subr.msk.bf16.mxu0 %vm470_vm1, %v1722_v8 }
  0x1b   : > { %1563 = vmatpush3.bf16.msra.mxu0 %v472_v9 }
  0x1e   : > { %1565 = vmatmul.mubr.msk.bf16.vlgmr.msra.gmra.mrb[0].mxu0 %vm463_vm0, %v1724_v10  ;;  %vm1955_vm0 = vmpackc.low %vm702_vm14, %vm702_vm14  ;;  %vm929_vm14 = vcmask 64512  }
  0x1f   : > { %1572 = vmatprep.mubr.msk.bf16.mxu0 %vm823_vm2, %v1728_v32 }
  0x86   : > { %v421_v12 = vpop.permute.xlu0 %420 }
  0x87   : > { %v431_v11 = vpop.permute.xlu1 %430 }
  0x8a   : > { %v426_v19 = vpop.permute.xlu0 %425 }
  0x8b   : > { %v436_v14 = vpop.permute.xlu1 %435 }
  0xf1   : > { %v1566_v13 = vpop.f32.mrb[0].mxu0 }
  0xf2   : > { %v517_v15 = vadd.f32 %v1566_v13, %v431_v11  ;;  %v508_v16 = vpop.f32.mrb[1].mxu0 }
  0xf3   : > { %v509_v17 = vadd.f32 %v508_v16, %v421_v12  ;;  %v1567_v18 = vpop.f32.mrb[2].mxu0 }
  0xf4   : > { %v520_v20 = vadd.f32 %v1567_v18, %v436_v14  ;;  %v511_v21 = vpop.f32.mrb[3].mxu0  ;;  %v525_v23 = vmax.f32 %v517_v15, 0.0 }
  0xf5   : > { %v512_v22 = vadd.f32 %v511_v21, %v426_v19  ;;  %v523_v25 = vmax.f32 %v509_v17, 0.0 }
  0xf6   : > { %v526_v24 = vmax.f32 %v520_v20, 0.0 }
  0xf7   : > { %v524_v26 = vmax.f32 %v512_v22, 0.0 }
  0xf8   : > { %v1645_v27 = vpack.i.bf16 %v526_v24, %v525_v23  ;;  %v1867_v30 = vpack.c.bf16 %v526_v24, %v525_v23 }
  0xf9   : > { %v1640_v28 = vpack.i.bf16 %v524_v26, %v523_v25  ;;  %v656_v29 = vpack.c.bf16 %v524_v26, %v523_v25 }
  0xfa   : > { %1646 = vrot.lane.b32.xlu1 %v1645_v27, %s1760_s16 }
  0xfb   : > { %1641 = vrot.lane.b32.xlu0 %v1640_v28, %s1760_s16  ;;  %1508 = vmatprep.subr.bf16.mxu1 %v656_v29 }
  0xfe   : > { %1661 = vrot.lane.b32.xlu1 %v1640_v28, %s1761_s19 }
  0xff   : > { %1651 = vrot.lane.b32.xlu0 %v1640_v28, %s1762_s20 }
 0x102   : > { %1666 = vrot.lane.b32.xlu1 %v1645_v27, %s1761_s19 }
 0x103   : > { %1656 = vrot.lane.b32.xlu0 %v1645_v27, %s1762_s20 }
 0x106   : > { %1681 = vrot.lane.b32.xlu1 %v1640_v28, %s1763_s21 }
 0x107   : > { %1671 = vrot.lane.b32.xlu0 %v1640_v28, %s1764_s22 }
 0x10a   : > { %1686 = vrot.lane.b32.xlu1 %v1645_v27, %s1763_s21 }
 0x10b   : > { %1676 = vrot.lane.b32.xlu0 %v1645_v27, %s1764_s22 }
 0x10e   : > { %1701 = vrot.lane.b32.xlu1 %v1640_v28, %s1765_s23 }
 0x10f   : > { %1691 = vrot.lane.b32.xlu0 %v1640_v28, %s1766_s24 }
 0x112   : > { %1706 = vrot.lane.b32.xlu1 %v1645_v27, %s1765_s23  ;;  %s1502_s23 = sshll.u32 %s2130_s18, 5 }
 0x113   : > { %1696 = vrot.lane.b32.xlu0 %v1645_v27, %s1766_s24 }
 0x116   : > { %1716 = vrot.lane.b32.xlu1 %v1645_v27, %s1767_s29 }
 0x117   : > { %1711 = vrot.lane.b32.xlu0 %v1640_v28, %s1767_s29  ;;  %s398_s29 = scalar_lea.vmem %s2104_s1, %s1416_s26  ;;  %s403_s26 = scalar_lea.vmem %s2114_s11, %s1502_s23 }
 0x11a   : > { %780 = vperm.xlu1 %1639, %v770_v33  }
 0x11b   : > { %775 = vperm.xlu0 %1638, %v769_v34  }
 0x11e   : > { %790 = vperm.xlu1 %1639, %v772_v35  }
 0x11f   : > { %785 = vperm.xlu0 %1638, %v771_v36  }
 0x122   : > { %1246 = vperm.xlu1 %1639, %v1236_v37  }
 0x123   : > { %1241 = vperm.xlu0 %1638, %v1235_v38  }
 0x126   : > { %1256 = vperm.xlu1 %1639, %v1238_v39  }
 0x127   : > { %1251 = vperm.xlu0 %1638, %v1237_v40  }
 0x16c   : > { %v1647_v44 = vpop.permute.xlu1 %1646 }
 0x16d   : > { %v1642_v45 = vpop.permute.xlu0 %1641  ;;  %v1649_v46 = vunpack.i.h.bf16 %v1647_v44  ;;  %v1648_v47 = vunpack.i.l.bf16 %v1647_v44 }
 0x16e   : > { %v1644_v48 = vunpack.i.h.bf16 %v1642_v45  ;;  %v1643_v49 = vunpack.i.l.bf16 %v1642_v45 }
 0x16f   : > { %v561_v58 = vsel %vm557_vm3, 0.0, %v1649_v46  ;;  %v560_v59 = vsel %vm557_vm3, 0.0, %v1648_v47 }
 0x170   : > { %v559_v50 = vsel %vm557_vm3, 0.0, %v1644_v48  ;;  %v558_v51 = vsel %vm557_vm3, 0.0, %v1643_v49  ;;  %v1662_v52 = vpop.permute.xlu1 %1661  ;;  %v1436_v1 = vpack.c.bf16 %v561_v58, %v560_v59 }
 0x171   : > { %v1664_v54 = vunpack.i.h.bf16 %v1662_v52  ;;  %v1663_v55 = vunpack.i.l.bf16 %v1662_v52  ;;  %v1652_v56 = vpop.permute.xlu0 %1651  ;;  %v1433_v57 = vpack.c.bf16 %v559_v50, %v558_v51 }
 0x172   : > { %v1654_v60 = vunpack.i.h.bf16 %v1652_v56  ;;  %v1653_v61 = vunpack.i.l.bf16 %v1652_v56 }
 0x173   : > { %1509 = vmatpush3.bf16.msk.msra.mxu1 %vm1905_vm7, %v1433_v57  ;;  %v585_v2 = vsel %vm583_vm5, 0.0, %v1664_v54  ;;  %v584_v3 = vsel %vm583_vm5, 0.0, %v1663_v55 }
 0x174   : > { %v672_v62 = vsel %vm670_vm6, %v1654_v60, 0.0  ;;  %v671_v63 = vsel %vm670_vm6, %v1653_v61, 0.0  ;;  %v1667_v0 = vpop.permute.xlu1 %1666  ;;  %1510 = vmatprep.subr.bf16.mxu1 %v1867_v30  ;;  %v1439_v15 = vpack.c.bf16 %v585_v2, %v584_v3  ;;  %v1103_v3 = vld [vmem:[%s2111_s8 + $0x8] sm:$0xff] }
 0x175   : > { %v1457_v4 = vpack.c.bf16 %v672_v62, %v671_v63  ;;  %v1657_v5 = vpop.permute.xlu0 %1656  ;;  %v1669_v7 = vunpack.i.h.bf16 %v1667_v0  ;;  %v1668_v8 = vunpack.i.l.bf16 %v1667_v0 }
 0x176   : > { %v1659_v9 = vunpack.i.h.bf16 %v1657_v5  ;;  %v1658_v10 = vunpack.i.l.bf16 %v1657_v5 }
 0x177   : > { %1511 = vmatpush3.bf16.msk.msra.mxu1 %vm1905_vm7, %v1436_v1  ;;  %v587_v20 = vsel %vm583_vm5, 0.0, %v1669_v7  ;;  %v586_v21 = vsel %vm583_vm5, 0.0, %v1668_v8  ;;  %vm722_vm5 = vcmask 39936   ;;  %vm728_vm7 = vcmp.lt.s32.totalorder %v1900_v43, 5 }
 0x178   : > { %v674_v11 = vsel %vm670_vm6, %v1659_v9, 0.0  ;;  %v673_v12 = vsel %vm670_vm6, %v1658_v10, 0.0  ;;  %v1682_v13 = vpop.permute.xlu1 %1681  ;;  %1512 = vmatprep.subr.msk.bf16.mxu1 %vm1923_vm10, %v1457_v4  ;;  %v1442_v27 = vpack.c.bf16 %v587_v20, %v586_v21  ;;  %vm1968_vm6 = vmpackc.low %vm614_vm15, %vm614_vm15  ;;  %v1730_v21 = vld [vmem:[%s2108_s5 + $0x1c] ss:$12 sps:$4 sm:$0xff]   ;;  %vm1769_vm15 = vmmov 0  }
 0x179   : > { %v1460_v16 = vpack.c.bf16 %v674_v11, %v673_v12  ;;  %v1684_v17 = vunpack.i.h.bf16 %v1682_v13  ;;  %v1683_v18 = vunpack.i.l.bf16 %v1682_v13  ;;  %v1672_v19 = vpop.permute.xlu0 %1671  ;;  %vm1987_vm9 = vmpackc.low %vm728_vm7, %vm728_vm7 }
 0x17a   : > { %v1674_v22 = vunpack.i.h.bf16 %v1672_v19  ;;  %v1673_v23 = vunpack.i.l.bf16 %v1672_v19  ;;  %v1725_v19 = vld [vmem:[%s2108_s5] ss:$12 sps:$4 sm:$0xff]  }
 0x17b   : > { %1513 = vmatpush3.bf16.msk.msra.mxu1 %vm1936_vm13, %v1439_v15  ;;  %v611_v28 = vsel %vm609_vm11, 0.0, %v1684_v17  ;;  %v610_v29 = vsel %vm609_vm11, 0.0, %v1683_v18 }
 0x17c   : > { %v698_v24 = vsel %vm696_vm12, %v1674_v22, 0.0  ;;  %v697_v25 = vsel %vm696_vm12, %v1673_v23, 0.0  ;;  %v1687_v26 = vpop.permute.xlu1 %1686  ;;  %1514 = vmatprep.subr.msk.bf16.mxu1 %vm1923_vm10, %v1460_v16  ;;  %v1445_v41 = vpack.c.bf16 %v611_v28, %v610_v29  ;;  %vm2000_vm10 = vmpackc.low %vm640_vm8, %vm640_vm8  ;;  %v1732_v22 = vld [vmem:[%s2108_s5 + $0x18] ss:$12 sps:$4 sm:$0xff]  }
 0x17d   : > { %v1463_v30 = vpack.c.bf16 %v698_v24, %v697_v25  ;;  %v1677_v31 = vpop.permute.xlu0 %1676  ;;  %v1689_v33 = vunpack.i.h.bf16 %v1687_v26  ;;  %v1688_v34 = vunpack.i.l.bf16 %v1687_v26  ;;  %v928_v23 = vld [vmem:[%s2105_s2] sm:$0xff] }
 0x17e   : > { %v1679_v35 = vunpack.i.h.bf16 %v1677_v31  ;;  %v1678_v36 = vunpack.i.l.bf16 %v1677_v31 }
 0x17f   : > { %1515 = vmatpush3.bf16.msk.msra.mxu1 %vm1936_vm13, %v1442_v27  ;;  %v613_v47 = vsel %vm609_vm11, 0.0, %v1689_v33  ;;  %v612_v48 = vsel %vm609_vm11, 0.0, %v1688_v34 }
 0x180   : > { %v700_v37 = vsel %vm696_vm12, %v1679_v35, 0.0  ;;  %v699_v38 = vsel %vm696_vm12, %v1678_v36, 0.0  ;;  %v1702_v39 = vpop.permute.xlu1 %1701  ;;  %1516 = vmatprep.subr.msk.bf16.mxu1 %vm1955_vm0, %v1463_v30  ;;  %v1448_v54 = vpack.c.bf16 %v613_v47, %v612_v48  ;;  %vm753_vm12 = vcmp.lt.s32.totalorder %v1900_v43, 4  ;;  %v1729_v43 = vld [vmem:[%s2108_s5 + $0x20] ss:$12 sps:$4 sm:$0xff]  }
 0x181   : > { %v1466_v42 = vpack.c.bf16 %v700_v37, %v699_v38  ;;  %v1704_v44 = vunpack.i.h.bf16 %v1702_v39  ;;  %v1703_v45 = vunpack.i.l.bf16 %v1702_v39  ;;  %v1692_v46 = vpop.permute.xlu0 %1691  ;;  %vm1474_vm13 = vmpackc.low %vm753_vm12, %vm753_vm12 }
 0x182   : > { %v1694_v49 = vunpack.i.h.bf16 %v1692_v46  ;;  %v1693_v50 = vunpack.i.l.bf16 %v1692_v46 }
 0x183   : > { %1517 = vmatpush3.bf16.msk.msra.mxu1 %vm1968_vm6, %v1445_v41  ;;  %v637_v55 = vsel %vm635_vm4, 0.0, %v1704_v44  ;;  %v636_v56 = vsel %vm635_vm4, 0.0, %v1703_v45 }
 0x184   : > { %v724_v51 = vsel %vm722_vm5, %v1694_v49, 0.0  ;;  %v723_v52 = vsel %vm722_vm5, %v1693_v50, 0.0  ;;  %v1707_v53 = vpop.permute.xlu1 %1706  ;;  %1518 = vmatprep.subr.msk.bf16.mxu1 %vm1955_vm0, %v1466_v42  ;;  %v1451_v4 = vpack.c.bf16 %v637_v55, %v636_v56 }
 0x185   : > { %v1469_v57 = vpack.c.bf16 %v724_v51, %v723_v52  ;;  %v1697_v58 = vpop.permute.xlu0 %1696  ;;  %v1709_v60 = vunpack.i.h.bf16 %v1707_v53  ;;  %v1708_v61 = vunpack.i.l.bf16 %v1707_v53  ;;  %v1768_v53 = vmov 0.0|0.0  }
 0x186   : > { %v1699_v62 = vunpack.i.h.bf16 %v1697_v58  ;;  %v1698_v63 = vunpack.i.l.bf16 %v1697_v58 }
 0x187   : > { %1519 = vmatpush3.bf16.msk.msra.mxu1 %vm1968_vm6, %v1448_v54  ;;  %v639_v9 = vsel %vm635_vm4, 0.0, %v1709_v60  ;;  %v638_v10 = vsel %vm635_vm4, 0.0, %v1708_v61  ;;  %v1770_v54 = vmov 0.0   ;;  %v1027_v61 = vld [vmem:[%s2110_s7] sm:$0x3] }
 0x188   : > { %v726_v0 = vsel %vm722_vm5, %v1699_v62, 0.0  ;;  %v725_v1 = vsel %vm722_vm5, %v1698_v63, 0.0  ;;  %v1717_v2 = vpop.permute.xlu1 %1716  ;;  %1520 = vmatprep.subr.msk.bf16.mxu1 %vm1987_vm9, %v1469_v57  ;;  %v1454_v17 = vpack.c.bf16 %v639_v9, %v638_v10  ;;  %v1102_v62 = vld [vmem:[%s2111_s8] sm:$0xff] }
 0x189   : > { %v1472_v5 = vpack.c.bf16 %v726_v0, %v725_v1  ;;  %v1719_v6 = vunpack.i.h.bf16 %v1717_v2  ;;  %v1718_v7 = vunpack.i.l.bf16 %v1717_v2  ;;  %v1712_v8 = vpop.permute.xlu0 %1711  ;;  %v1234_v0 = vld [vmem:[%s398_s29] sm:$0x3] }
 0x18a   : > { %v1714_v11 = vunpack.i.h.bf16 %v1712_v8  ;;  %v1713_v12 = vunpack.i.l.bf16 %v1712_v8  ;;  %v1734_v8 = vld [vmem:[%s2112_s9 + $0x8] sm:$0xff]  }
 0x18b   : > { %1521 = vmatpush3.bf16.msk.msra.mxu1 %vm2000_vm10, %v1451_v4  ;;  %v751_v13 = vsel %vm557_vm3, %v1719_v6, 0.0  ;;  %v750_v14 = vsel %vm557_vm3, %v1718_v7, 0.0  ;;  %v1104_v4 = vld [vmem:[%s2111_s8 + $0x10] sm:$0xff]  ;;  %v1105_v6 = vld [vmem:[%s2111_s8 + $0x18] sm:$0xff]  ;;  %v1733_v7 = vld [vmem:[%s2112_s9] sm:$0xff]  }
 0x18c   : > { %v749_v15 = vsel %vm557_vm3, %v1714_v11, 0.0  ;;  %v748_v16 = vsel %vm557_vm3, %v1713_v12, 0.0  ;;  %1522 = vmatprep.subr.msk.bf16.mxu1 %vm1987_vm9, %v1472_v5  ;;  %v1478_v20 = vpack.c.bf16 %v751_v13, %v750_v14  ;;  %v1276_v5 = vsel %vm470_vm1, %v1234_v0, 0 }
 0x18d   : > { %v1475_v18 = vpack.c.bf16 %v749_v15, %v748_v16 }
 0x18f   : > { %1523 = vmatpush3.bf16.msk.msra.mxu1 %vm2000_vm10, %v1454_v17  ;;  %1568 = vmatprep.subr.msk.bf16.mxu0 %vm1474_vm13, %v1475_v18 }
 0x190   : > { %1569 = vmatpush3.bf16.msk.msra.mxu0 %vm1474_vm13, %v1475_v18  ;;  %1609 = vmatprep.subr.bf16.mxu1 %v1768_v53 }
 0x191   : > { %1570 = vmatprep.subr.msk.bf16.mxu0 %vm1474_vm13, %v1478_v20 }
 0x192   : > { %863 = vmatmul.mubr.bf16.vlgmr.msra.gmra.mrb[0].mxu1 %v1725_v19 }
 0x193   : > { %870 = vmatprep.mubr.bf16.mxu1 %v1730_v21 }
 0x194   : > { %1571 = vmatpush3.bf16.msk.msra.mxu0 %vm1474_vm13, %v1478_v20 }
 0x195   : > { %1576 = vmatprep.subr.mxu0 %v928_v23 }
 0x197   : > { %1573 = vmatmul.mubr.msk.bf16.vlgmr.msra.gmra.mrb[4].mxu0 %vm823_vm2, %v1729_v43 }
 0x198   : > { %1577 = vmatpush3.msra.mxu0 %v928_v23 }
 0x199   : > { %v781_v32 = vpop.permute.xlu1 %780 }
 0x19a   : > { %871 = vmatmul.mubr.bf16.gmra.mrb[4].mxu1 %v1732_v22  ;;  %v776_v28 = vpop.permute.xlu0 %775 }
 0x19b   : > { %1592 = vmatprep.mubr.msk.f32.mxu1 %vm1769_vm15, %v1770_v54 }
 0x19d   : > { %v791_v49 = vpop.permute.xlu1 %790 }
 0x19e   : > { %v786_v45 = vpop.permute.xlu0 %785 }
 0x265   : > { %v1524_v24 = vpop.f32.mrb[0].mxu1 }
 0x266   : > { %v1525_v25 = vpop.f32.mrb[1].mxu1 }
 0x267   : > { %v1526_v26 = vadd.f32 %v1525_v25, %v1524_v24  ;;  %v1527_v27 = vpop.f32.mrb[2].mxu1 }
 0x268   : > { %v1528_v29 = vpop.f32.mrb[3].mxu1 }
 0x269   : > { %v1529_v30 = vadd.f32 %v1528_v29, %v1527_v27  ;;  %v865_v31 = vadd.f32 %v1526_v26, %v776_v28  ;;  %v1247_v28 = vpop.permute.xlu1 %1246  ;;  %v1242_v29 = vpop.permute.xlu0 %1241 }
 0x26a   : > { %v1574_v33 = vpop.f32.mrb[4].mxu0 }
 0x26b   : > { %v913_v34 = vpop.f32.mrb[5].mxu0  ;;  %v868_v35 = vadd.f32 %v1529_v30, %v781_v32 }
 0x26c   : > { %v2036_v36 = vadd.f32 %v913_v34, %v865_v31  ;;  %v1575_v37 = vpop.f32.mrb[6].mxu0 }
 0x26d   : > { %v1530_v38 = vpop.f32.mrb[4].mxu1  ;;  %v916_v39 = vpop.f32.mrb[7].mxu0 }
 0x26e   : > { %v2038_v40 = vadd.f32 %v916_v39, %v868_v35  ;;  %v1531_v41 = vpop.f32.mrb[5].mxu1  ;;  %1578 = vmatprep.mubr.msk.f32.mxu0 %vm929_vm14, %v2036_v36  ;;  %v1257_v39 = vpop.permute.xlu1 %1256 }
 0x26f   : > { %v1532_v42 = vadd.f32 %v1531_v41, %v1530_v38  ;;  %v1533_v44 = vpop.f32.mrb[6].mxu1 }
 0x270   : > { %v1534_v46 = vpop.f32.mrb[7].mxu1  ;;  %1579 = vmatmul.mubr.msk.f32.vlgmr.msra.gmra.mrb[8].mxu0 %vm929_vm14, %v2038_v40 }
 0x271   : > { %v873_v47 = vadd.f32 %v1532_v42, %v786_v45  ;;  %v1535_v48 = vadd.f32 %v1534_v46, %v1533_v44  ;;  %v1252_v44 = vpop.permute.xlu0 %1251 }
 0x273   : > { %v2044_v50 = vadd.f32 %v1574_v33, %v873_v47  ;;  %v876_v51 = vadd.f32 %v1535_v48, %v791_v49 }
 0x275   : > { %v2046_v52 = vadd.f32 %v1575_v37, %v876_v51  ;;  %1581 = vmatprep.mubr.msk.f32.mxu0 %vm929_vm14, %v2044_v50 }
 0x277   : > { %1582 = vmatmul.mubr.msk.f32.gmra.mrb[10].mxu0 %vm929_vm14, %v2046_v52 }
 0x278   : > { %1597 = vmatprep.mubr.msk.f32.mxu0 %vm609_vm11, %v1102_v62 }
 0x343   : > { %v1580_v55 = vpop.f32.mrb[8].mxu0 }
 0x344   : > { %v1008_v56 = vpop.f32.mrb[9].mxu0 }
 0x345   : > { %v1610_v57 = vpack.c.bf16 %v1580_v55, %v1008_v56 }
 0x347   : > { %1611 = vmatpush3.bf16.msra.mxu1 %v1610_v57 }
 0x348   : > { %1612 = vmatprep.subr.bf16.mxu1 %v1768_v53 }
 0x34a   : > { %v1583_v58 = vpop.f32.mrb[10].mxu0 }
 0x34b   : > { %v1018_v59 = vpop.f32.mrb[11].mxu0 }
 0x34c   : > { %v1613_v60 = vpack.c.bf16 %v1583_v58, %v1018_v59 }
 0x34e   : > { %1614 = vmatpush3.bf16.msra.mxu1 %v1613_v60 }
 0x351   : > { %1593 = vmatmul.mubr.msk.f32.vlgmr.msra.gmra.mrb[8].mxu1 %vm823_vm2, %v1027_v61 }
 0x424   : > { %v1097_v63 = vpop.f32.mrb[8].mxu1 }
 0x425   : > { %v1101_v1 = vmax.f32 %v1097_v63, 0.0  ;;  %v1594_v2 = vpop.f32.mrb[9].mxu1 }
 0x427   : > { %1595 = vmatprep.subr.msk.mxu0 %vm470_vm1, %v1101_v1 }
 0x428   : > { %1596 = vmatpush3.msk.msra.mxu0 %vm470_vm1, %v1101_v1 }
 0x429   : > { %1598 = vmatmul.mubr.msk.f32.vlgmr.msra.gmra.mrb[12].mxu0 %vm609_vm11, %v1103_v3  ;;  %1616 = vmatprep.subr.msk.bf16.mxu0 %vm470_vm1, %v1234_v0 }
 0x42a   : > { %1600 = vmatprep.mubr.msk.f32.mxu0 %vm609_vm11, %v1104_v4  ;;  %1604 = vmatpush3.bf16.msra.mxu0 %v1276_v5 }
 0x42d   : > { %1601 = vmatmul.mubr.msk.f32.gmra.mrb[14].mxu0 %vm609_vm11, %v1105_v6 }
 0x42e   : > { %1605 = vmatprep.mubr.msk.bf16.mxu0 %vm557_vm3, %v1733_v7 }
 0x431   : > { %1606 = vmatmul.mubr.msk.bf16.vlgmr.msra.gmra.mrb[16].mxu0 %vm557_vm3, %v1734_v8 }
 0x4fc   : > { %v1599_v9 = vpop.f32.mrb[12].mxu0 }
 0x4fd   : > { %v1493_v10 = vmul.f32 -1.442695, %v1599_v9  ;;  %v1187_v11 = vpop.f32.mrb[13].mxu0 }
 0x4fe   : > { %v1492_v12 = vmul.f32 -1.442695, %v1187_v11 }
 0x4ff   : > { %1735 = vpow2.f32 %v1493_v10 }
 0x500   : > { %1737 = vpow2.f32 %v1492_v12  ;;  %v1602_v13 = vpop.f32.mrb[14].mxu0 }
 0x501   : > { %v1495_v14 = vmul.f32 -1.442695, %v1602_v13  ;;  %v1197_v15 = vpop.f32.mrb[15].mxu0 }
 0x502   : > { %v1494_v16 = vmul.f32 -1.442695, %v1197_v15 }
 0x503   : > { %1739 = vpow2.f32 %v1495_v14 }
 0x504   : > { %1741 = vpow2.f32 %v1494_v16  ;;  %v1607_v17 = vpop.f32.mrb[16].mxu0 }
 0x505   : > { %v1312_v18 = vpop.f32.mrb[17].mxu0  ;;  %v1321_v48 = vadd.f32 %v1607_v17, %v1252_v44 }
 0x506   : > { %v1608_v19 = vpop.f32.mrb[18].mxu0  ;;  %v1313_v34 = vadd.f32 %v1312_v18, %v1242_v29 }
 0x507   : > { %v1315_v20 = vpop.f32.mrb[19].mxu0  ;;  %v1324_v45 = vadd.f32 %v1608_v19, %v1257_v39 }
 0x508   : > { %v1316_v32 = vadd.f32 %v1315_v20, %v1247_v28 }
 0x509   : > { %v1736_v21 = vpop.eup %1735 }
 0x50a   : > { %v1738_v43 = vpop.eup %1737  ;;  %v1219_v22 = vadd.f32 1.0, %v1736_v21 }
 0x50b   : > { %v1218_v23 = vadd.f32 1.0, %v1738_v43 }
 0x50c   : > { %1743 = vrcp.f32 %v1219_v22 }
 0x50d   : > { %v1740_v24 = vpop.eup %1739  ;;  %1745 = vrcp.f32 %v1218_v23 }
 0x50e   : > { %v1742_v25 = vpop.eup %1741  ;;  %v1221_v26 = vadd.f32 1.0, %v1740_v24 }
 0x50f   : > { %v1220_v27 = vadd.f32 1.0, %v1742_v25 }
 0x510   : > { %1747 = vrcp.f32 %v1221_v26 }
 0x511   : > { %1749 = vrcp.f32 %v1220_v27 }
 0x516   : > { %v1744_v30 = vpop.eup %1743 }
 0x517   : > { %v1746_v31 = vpop.eup %1745  ;;  %v1328_v33 = vmul.f32 %v1744_v30, %v2038_v40 }
 0x518   : > { %v1327_v35 = vmul.f32 %v1746_v31, %v2036_v36 }
 0x519   : > { %v1332_v37 = vadd.f32 %v1328_v33, %v1316_v32 }
 0x51a   : > { %v1748_v38 = vpop.eup %1747  ;;  %v1331_v41 = vadd.f32 %v1327_v35, %v1313_v34 }
 0x51b   : > { %v1750_v42 = vpop.eup %1749  ;;  %v1330_v46 = vmul.f32 %v1748_v38, %v2046_v52  ;;  %v1336_v47 = vmax.f32 %v1332_v37, 0.0 }
 0x51c   : > { %v1329_v40 = vmul.f32 %v1750_v42, %v2044_v50  ;;  %v1335_v49 = vmax.f32 %v1331_v41, 0.0 }
 0x51d   : > { %v1334_v51 = vadd.f32 %v1330_v46, %v1324_v45  ;;  %1340 = vst.msk [vmem:[%s403_s26 + $0x8] sm:$0xff] %vm929_vm14, %v1336_v47 }
 0x51e   : > { %v1333_v36 = vadd.f32 %v1329_v40, %v1321_v48  ;;  %1339 = vst.msk [vmem:[%s403_s26] sm:$0xff] %vm929_vm14, %v1335_v49 }
 0x51f   : > { %v1338_v53 = vmax.f32 %v1334_v51, 0.0 }
 0x520   : > { %v1337_v54 = vmax.f32 %v1333_v36, 0.0 }
 0x521   : > { %1342 = vst.msk [vmem:[%s403_s26 + $0x18] sm:$0xff] %vm929_vm14, %v1338_v53 }
 0x522   : > { %1341 = vst.msk [vmem:[%s403_s26 + $0x10] sm:$0xff] %vm929_vm14, %v1337_v54 }
 0x523 PF: > { %s21_s17 = sadd.s32 1, %s1757_s17  }
 0x524   : > { %p18_p4 = scmp.ge.s32.totalorder %s21_s17, 4  }
 0x526   :  { %20 = sbr.rel (!%p18_p4) target bundleno = 1 (0x1), region = 97 }

</bundles_post_ra>
